<compile_context>
chip_gen: v5e
topology: v5e:2x2
jax: 0.10.0
libtpu: 0.0.40
codegen_flags: <defaults>
</compile_context>

<pallas_src>
import numpy as np
import jax
import jax.numpy as jnp
from jax.experimental import pallas as pl
from jax.experimental.pallas import tpu as pltpu


# ---------------------------------------------------------------------------
# Deterministic parameter initialization (mirrors SimpleLinear.__init__)
# ---------------------------------------------------------------------------
def init_simple_linear(key, num_in, num_out, bavg=0.0, stddev=1.0,
                       use_timestep=False):
    k1, k2, k3 = jax.random.split(key, 3)
    matrix = jax.random.normal(k1, (num_in, num_out), jnp.float32) * (
        stddev / np.sqrt(num_out + num_in))
    bias = bavg + jax.random.normal(k2, (1, num_out), jnp.float32) * stddev
    params = {"matrix": matrix, "bias": bias}
    if use_timestep:
        params["idt"] = 0.1 + jax.random.normal(k3, (1, num_out),
                                                jnp.float32) * 0.001
    return params


def build_residual_deep_params(key, embedding_width, neuron, bias_atom_e,
                               resnet_dt=False):
    sizes = [embedding_width] + list(neuron)
    layers = []
    for ii in range(1, len(sizes)):
        key, sub = jax.random.split(key)
        use_ts = resnet_dt and ii > 1 and (sizes[ii - 1] == sizes[ii])
        p = init_simple_linear(sub, sizes[ii - 1], sizes[ii],
                               use_timestep=use_ts)
        layers.append(dict(
            params=p,
            use_timestep=use_ts,
            activate=True,
            # ResidualDeep.forward: residual add when idx > 0 and in == out
            residual=(ii - 1 > 0 and sizes[ii - 1] == sizes[ii]),
        ))
    key, sub = jax.random.split(key)
    final = dict(
        params=init_simple_linear(sub, sizes[-1], 1, bavg=bias_atom_e),
        use_timestep=False,
        activate=False,
        residual=False,
    )
    return layers, final


# ---------------------------------------------------------------------------
# Pallas kernel (whole MLP fused, unrolled at trace time over the layers)
#
# Transposed layout inside the kernel:
#   x_ref : (D, tm)            -- rows on lanes, features on sublanes
#   Wt    : (num_out, num_in)  -- pre-transposed in the wrapper
#   bt/idt: (num_out, 1)       -- broadcast along the lane (row) axis
#   final : w (D_last, 1), b (1, 1)  -> VPU mul + sublane reduce, no MXU
#   o_ref : (1, tm)            -- lane-dense store
# ---------------------------------------------------------------------------
def make_kernel(layer_cfgs):
    # layer_cfgs: static list of dicts
    #   {"use_timestep", "activate", "residual", "final"}
    def kernel(*refs):
        x_ref = refs[0]
        o_ref = refs[-1]
        param_refs = refs[1:-1]

        h = x_ref[...].astype(jnp.float32)           # (D, tm)
        pi = 0
        for cfg in layer_cfgs:
            if cfg["final"]:
                w = param_refs[pi][...]; pi += 1     # (D_last, 1)
                b = param_refs[pi][...]; pi += 1     # (1, 1)
                # Width-1 projection: VPU multiply + feature-axis (sublane)
                # reduction instead of a 1-wide MXU matmul.
                h = jnp.sum(h * w, axis=0, keepdims=True) + b   # (1, tm)
            else:
                Wt = param_refs[pi][...]; pi += 1    # (num_out, num_in)
                bt = param_refs[pi][...]; pi += 1    # (num_out, 1)
                y = jnp.dot(Wt, h, preferred_element_type=jnp.float32) + bt
                if cfg["activate"]:
                    y = jnp.tanh(y)
                if cfg["use_timestep"]:
                    idt = param_refs[pi][...]; pi += 1   # (num_out, 1)
                    y = y * idt
                h = h + y if cfg["residual"] else y
        o_ref[...] = h.astype(o_ref.dtype)

    return kernel


def residual_deep_forward(x, layers, final, tm=512):
    """x: [nframes*nloc, embedding_width] -> [nframes*nloc, 1]."""
    N, D = x.shape
    assert tm % 128 == 0, "row tile must be a multiple of the 128-lane width"

    n_tiles = pl.cdiv(N, tm)
    N_pad = n_tiles * tm

    # Wrapper-side layout plumbing: rows onto the lane axis.
    xT = x.T                                   # (D, N)
    if N_pad != N:
        xT = jnp.pad(xT, ((0, 0), (0, N_pad - N)))

    layer_cfgs = []
    flat_params = []
    in_specs = [pl.BlockSpec((D, tm), lambda i: (0, i))]

    def full_spec(shape):
        # whole-array block, same block for every grid step (stays in VMEM)
        return pl.BlockSpec(shape, lambda i, _nd=len(shape): (0,) * _nd)

    # Hidden layers: pre-transposed weights / column biases.
    for layer in layers:
        p = layer["params"]
        wt = p["matrix"].T                     # (num_out, num_in)
        bt = p["bias"].T                       # (num_out, 1)
        flat_params.append(wt); in_specs.append(full_spec(wt.shape))
        flat_params.append(bt); in_specs.append(full_spec(bt.shape))
        if layer["use_timestep"]:
            it = p["idt"].T                    # (num_out, 1)
            flat_params.append(it); in_specs.append(full_spec(it.shape))
        layer_cfgs.append(dict(use_timestep=layer["use_timestep"],
                               activate=layer["activate"],
                               residual=layer["residual"],
                               final=False))

    # Final 32 -> 1 projection (no activation): keep original (D_last, 1)
    # orientation so the kernel can do mul + sublane-reduce.
    fp = final["params"]
    w_fin = fp["matrix"]                       # (D_last, 1)
    b_fin = fp["bias"].reshape(1, 1)           # (1, 1)
    flat_params.append(w_fin); in_specs.append(full_spec(w_fin.shape))
    flat_params.append(b_fin); in_specs.append(full_spec(b_fin.shape))
    layer_cfgs.append(dict(use_timestep=False, activate=False,
                           residual=False, final=True))

    kernel = make_kernel(layer_cfgs)

    outT = pl.pallas_call(
        kernel,
        out_shape=jax.ShapeDtypeStruct((1, N_pad), x.dtype),
        grid_spec=pltpu.PrefetchScalarGridSpec(
            num_scalar_prefetch=0,
            grid=(n_tiles,),
            in_specs=in_specs,
            out_specs=pl.BlockSpec((1, tm), lambda i: (0, i)),
        ),
        compiler_params=pltpu.CompilerParams(
            dimension_semantics=("parallel",)),
    )(xT, *flat_params)

    # (1, N_pad) -> (N, 1), dropping row padding.
    return outT[:, :N].T


# ---------------------------------------------------------------------------
# Pure-JAX reference (mirrors ResidualDeep.forward semantics exactly)
# ---------------------------------------------------------------------------
def residual_deep_ref(x, layers, final):
    h = x
    for layer in layers + [final]:
        p = layer["params"]
        y = h @ p["matrix"] + p["bias"]
        if layer["activate"]:
            y = jnp.tanh(y)
        if layer["use_timestep"]:
            y = y * p["idt"]
        h = h + y if layer["residual"] else y
    return h


if __name__ == "__main__":
    key = jax.random.PRNGKey(0)

    # Small synthetic config: embedding_width=32, neuron=[32, 32, 32],
    # bias_atom_e=-2.5, resnet_dt=True (so idt is used on layers 2 and 3).
    embedding_width = 32
    neuron = [32, 32, 32]
    bias_atom_e = -2.5
    resnet_dt = True

    key, pkey, xkey = jax.random.split(key, 3)
    layers, final = build_residual_deep_params(
        pkey, embedding_width, neuron, bias_atom_e, resnet_dt=resnet_dt)

    # inputs: [nframes*nloc, embedding_width]; N chosen so the default tm=512
    # gives 2 grid steps (keeps both TensorCores busy on v7x).
    N = 1024
    x = jax.random.normal(xkey, (N, embedding_width), jnp.float32)

    out = residual_deep_forward(x, layers, final, tm=512)
    out = jax.block_until_ready(out)

    ref = residual_deep_ref(x, layers, final)
    assert out.shape == (N, 1), out.shape
    np.testing.assert_allclose(np.asarray(out), np.asarray(ref),
                               rtol=1e-5, atol=1e-5)

    print("KERNEL_OK")
</pallas_src>

<mosaic_0001>
module attributes {stable_mosaic.version = 11 : i64} {
  func.func @kernel(%arg0: i32, %arg1: memref<32x512xf32, #tpu.memory_space<vmem>>, %arg2: memref<32x32xf32, #tpu.memory_space<vmem>>, %arg3: memref<32x1xf32, #tpu.memory_space<vmem>>, %arg4: memref<32x32xf32, #tpu.memory_space<vmem>>, %arg5: memref<32x1xf32, #tpu.memory_space<vmem>>, %arg6: memref<32x1xf32, #tpu.memory_space<vmem>>, %arg7: memref<32x32xf32, #tpu.memory_space<vmem>>, %arg8: memref<32x1xf32, #tpu.memory_space<vmem>>, %arg9: memref<32x1xf32, #tpu.memory_space<vmem>>, %arg10: memref<32x1xf32, #tpu.memory_space<vmem>>, %arg11: memref<1x1xf32, #tpu.memory_space<vmem>>, %arg12: memref<1x512xf32, #tpu.memory_space<vmem>>) attributes {dimension_semantics = [#tpu.dimension_semantics<parallel>], iteration_bounds = array<i64: 2>, scalar_prefetch = 0 : i64, scratch_operands = 0 : i64, tpu.core_type = #tpu.core_type<tc>, window_params = [{transform_indices = @transform_0, window_bounds = array<i64: 32, 512>}, {pipeline_mode = #tpu.pipeline_mode<synchronous>, transform_indices = @transform_1, window_bounds = array<i64: 32, 32>}, {pipeline_mode = #tpu.pipeline_mode<synchronous>, transform_indices = @transform_2, window_bounds = array<i64: 32, 1>}, {pipeline_mode = #tpu.pipeline_mode<synchronous>, transform_indices = @transform_3, window_bounds = array<i64: 32, 32>}, {pipeline_mode = #tpu.pipeline_mode<synchronous>, transform_indices = @transform_4, window_bounds = array<i64: 32, 1>}, {pipeline_mode = #tpu.pipeline_mode<synchronous>, transform_indices = @transform_5, window_bounds = array<i64: 32, 1>}, {pipeline_mode = #tpu.pipeline_mode<synchronous>, transform_indices = @transform_6, window_bounds = array<i64: 32, 32>}, {pipeline_mode = #tpu.pipeline_mode<synchronous>, transform_indices = @transform_7, window_bounds = array<i64: 32, 1>}, {pipeline_mode = #tpu.pipeline_mode<synchronous>, transform_indices = @transform_8, window_bounds = array<i64: 32, 1>}, {pipeline_mode = #tpu.pipeline_mode<synchronous>, transform_indices = @transform_9, window_bounds = array<i64: 32, 1>}, {pipeline_mode = #tpu.pipeline_mode<synchronous>, transform_indices = @transform_10, window_bounds = array<i64: 1, 1>}, {transform_indices = @transform_11, window_bounds = array<i64: 1, 512>}]} {
    %c0 = arith.constant 0 : index
    %c0_0 = arith.constant 0 : index
    %0 = vector.load %arg1[%c0, %c0_0] : memref<32x512xf32, #tpu.memory_space<vmem>>, vector<32x512xf32>
    %c0_1 = arith.constant 0 : index
    %c0_2 = arith.constant 0 : index
    %1 = vector.load %arg2[%c0_1, %c0_2] : memref<32x32xf32, #tpu.memory_space<vmem>>, vector<32x32xf32>
    %c0_3 = arith.constant 0 : index
    %c0_4 = arith.constant 0 : index
    %2 = vector.load %arg3[%c0_3, %c0_4] : memref<32x1xf32, #tpu.memory_space<vmem>>, vector<32x1xf32>
    %cst = arith.constant dense<0.000000e+00> : vector<32x512xf32>
    %3 = tpu.matmul %1, %0, %cst {dimension_numbers = #tpu.dot_dimension_numbers<[1], [0], [0], [1], [0, 0, 1, 1], [], []>} : vector<32x32xf32>, vector<32x512xf32>, vector<32x512xf32> -> vector<32x512xf32>
    %4 = vector.broadcast %2 : vector<32x1xf32> to vector<32x512xf32>
    %5 = arith.addf %3, %4 : vector<32x512xf32>
    %6 = math.tanh %5 : vector<32x512xf32>
    %c0_5 = arith.constant 0 : index
    %c0_6 = arith.constant 0 : index
    %7 = vector.load %arg4[%c0_5, %c0_6] : memref<32x32xf32, #tpu.memory_space<vmem>>, vector<32x32xf32>
    %c0_7 = arith.constant 0 : index
    %c0_8 = arith.constant 0 : index
    %8 = vector.load %arg5[%c0_7, %c0_8] : memref<32x1xf32, #tpu.memory_space<vmem>>, vector<32x1xf32>
    %cst_9 = arith.constant dense<0.000000e+00> : vector<32x512xf32>
    %9 = tpu.matmul %7, %6, %cst_9 {dimension_numbers = #tpu.dot_dimension_numbers<[1], [0], [0], [1], [0, 0, 1, 1], [], []>} : vector<32x32xf32>, vector<32x512xf32>, vector<32x512xf32> -> vector<32x512xf32>
    %10 = vector.broadcast %8 : vector<32x1xf32> to vector<32x512xf32>
    %11 = arith.addf %9, %10 : vector<32x512xf32>
    %12 = math.tanh %11 : vector<32x512xf32>
    %c0_10 = arith.constant 0 : index
    %c0_11 = arith.constant 0 : index
    %13 = vector.load %arg6[%c0_10, %c0_11] : memref<32x1xf32, #tpu.memory_space<vmem>>, vector<32x1xf32>
    %14 = vector.broadcast %13 : vector<32x1xf32> to vector<32x512xf32>
    %15 = arith.mulf %12, %14 : vector<32x512xf32>
    %16 = arith.addf %6, %15 : vector<32x512xf32>
    %c0_12 = arith.constant 0 : index
    %c0_13 = arith.constant 0 : index
    %17 = vector.load %arg7[%c0_12, %c0_13] : memref<32x32xf32, #tpu.memory_space<vmem>>, vector<32x32xf32>
    %c0_14 = arith.constant 0 : index
    %c0_15 = arith.constant 0 : index
    %18 = vector.load %arg8[%c0_14, %c0_15] : memref<32x1xf32, #tpu.memory_space<vmem>>, vector<32x1xf32>
    %cst_16 = arith.constant dense<0.000000e+00> : vector<32x512xf32>
    %19 = tpu.matmul %17, %16, %cst_16 {dimension_numbers = #tpu.dot_dimension_numbers<[1], [0], [0], [1], [0, 0, 1, 1], [], []>} : vector<32x32xf32>, vector<32x512xf32>, vector<32x512xf32> -> vector<32x512xf32>
    %20 = vector.broadcast %18 : vector<32x1xf32> to vector<32x512xf32>
    %21 = arith.addf %19, %20 : vector<32x512xf32>
    %22 = math.tanh %21 : vector<32x512xf32>
    %c0_17 = arith.constant 0 : index
    %c0_18 = arith.constant 0 : index
    %23 = vector.load %arg9[%c0_17, %c0_18] : memref<32x1xf32, #tpu.memory_space<vmem>>, vector<32x1xf32>
    %24 = vector.broadcast %23 : vector<32x1xf32> to vector<32x512xf32>
    %25 = arith.mulf %22, %24 : vector<32x512xf32>
    %26 = arith.addf %16, %25 : vector<32x512xf32>
    %c0_19 = arith.constant 0 : index
    %c0_20 = arith.constant 0 : index
    %27 = vector.load %arg10[%c0_19, %c0_20] : memref<32x1xf32, #tpu.memory_space<vmem>>, vector<32x1xf32>
    %c0_21 = arith.constant 0 : index
    %c0_22 = arith.constant 0 : index
    %28 = vector.load %arg11[%c0_21, %c0_22] : memref<1x1xf32, #tpu.memory_space<vmem>>, vector<1x1xf32>
    %29 = vector.broadcast %27 : vector<32x1xf32> to vector<32x512xf32>
    %30 = arith.mulf %26, %29 : vector<32x512xf32>
    %cst_23 = arith.constant dense<0.000000e+00> : vector<512xf32>
    %31 = vector.multi_reduction <add>, %30, %cst_23 [0] : vector<32x512xf32> to vector<512xf32>
    %32 = vector.shape_cast %31 : vector<512xf32> to vector<1x512xf32>
    %33 = vector.broadcast %28 : vector<1x1xf32> to vector<1x512xf32>
    %34 = arith.addf %32, %33 : vector<1x512xf32>
    %c0_24 = arith.constant 0 : index
    %c0_25 = arith.constant 0 : index
    %35 = vector.load %arg12[%c0_24, %c0_25] : memref<1x512xf32, #tpu.memory_space<vmem>>, vector<1x512xf32>
    tpu.vector_store %arg12[%c0_24, %c0_25], %34 {strides = array<i32>} : memref<1x512xf32, #tpu.memory_space<vmem>>, vector<1x512xf32>,
    return
  }
  func.func @transform_0(%arg0: i32) -> (i32, i32) {
    %c0_i32 = arith.constant 0 : i32
    %c0_i32_0 = arith.constant 0 : i32
    return %c0_i32, %arg0 : i32, i32
  }
  func.func @transform_1(%arg0: i32) -> (i32, i32) {
    %c0_i32 = arith.constant 0 : i32
    %c0_i32_0 = arith.constant 0 : i32
    %c0_i32_1 = arith.constant 0 : i32
    return %c0_i32, %c0_i32_0 : i32, i32
  }
  func.func @transform_2(%arg0: i32) -> (i32, i32) {
    %c0_i32 = arith.constant 0 : i32
    %c0_i32_0 = arith.constant 0 : i32
    %c0_i32_1 = arith.constant 0 : i32
    return %c0_i32, %c0_i32_0 : i32, i32
  }
  func.func @transform_3(%arg0: i32) -> (i32, i32) {
    %c0_i32 = arith.constant 0 : i32
    %c0_i32_0 = arith.constant 0 : i32
    %c0_i32_1 = arith.constant 0 : i32
    return %c0_i32, %c0_i32_0 : i32, i32
  }
  func.func @transform_4(%arg0: i32) -> (i32, i32) {
    %c0_i32 = arith.constant 0 : i32
    %c0_i32_0 = arith.constant 0 : i32
    %c0_i32_1 = arith.constant 0 : i32
    return %c0_i32, %c0_i32_0 : i32, i32
  }
  func.func @transform_5(%arg0: i32) -> (i32, i32) {
    %c0_i32 = arith.constant 0 : i32
    %c0_i32_0 = arith.constant 0 : i32
    %c0_i32_1 = arith.constant 0 : i32
    return %c0_i32, %c0_i32_0 : i32, i32
  }
  func.func @transform_6(%arg0: i32) -> (i32, i32) {
    %c0_i32 = arith.constant 0 : i32
    %c0_i32_0 = arith.constant 0 : i32
    %c0_i32_1 = arith.constant 0 : i32
    return %c0_i32, %c0_i32_0 : i32, i32
  }
  func.func @transform_7(%arg0: i32) -> (i32, i32) {
    %c0_i32 = arith.constant 0 : i32
    %c0_i32_0 = arith.constant 0 : i32
    %c0_i32_1 = arith.constant 0 : i32
    return %c0_i32, %c0_i32_0 : i32, i32
  }
  func.func @transform_8(%arg0: i32) -> (i32, i32) {
    %c0_i32 = arith.constant 0 : i32
    %c0_i32_0 = arith.constant 0 : i32
    %c0_i32_1 = arith.constant 0 : i32
    return %c0_i32, %c0_i32_0 : i32, i32
  }
  func.func @transform_9(%arg0: i32) -> (i32, i32) {
    %c0_i32 = arith.constant 0 : i32
    %c0_i32_0 = arith.constant 0 : i32
    %c0_i32_1 = arith.constant 0 : i32
    return %c0_i32, %c0_i32_0 : i32, i32
  }
  func.func @transform_10(%arg0: i32) -> (i32, i32) {
    %c0_i32 = arith.constant 0 : i32
    %c0_i32_0 = arith.constant 0 : i32
    %c0_i32_1 = arith.constant 0 : i32
    return %c0_i32, %c0_i32_0 : i32, i32
  }
  func.func @transform_11(%arg0: i32) -> (i32, i32) {
    %c0_i32 = arith.constant 0 : i32
    %c0_i32_0 = arith.constant 0 : i32
    return %c0_i32, %arg0 : i32, i32
  }
}

</mosaic_0001>

<bundles_post_ra>
// kernel: tpu_custom_call.1
= control target key start
LH: loop header
LB: loop body
LE: loop exit
PB: predicated region body
PF: predicated region fallthrough
CT: control target
= control target key end

     0   :  { %s2112_s0 = inlined_call_operand.hbm [shape: f32[32,1024], index: 0, kind: input, shape index: {}]   ;;  %s2113_s1 = inlined_call_operand.vmem [shape: f32[32,32], index: 1, kind: input, shape index: {}]   ;;  %s2114_s2 = inlined_call_operand.vmem [shape: f32[32,1], index: 2, kind: input, shape index: {}]   ;;  %s2115_s3 = inlined_call_operand.vmem [shape: f32[32,32], index: 3, kind: input, shape index: {}]   ;;  %s2116_s4 = inlined_call_operand.vmem [shape: f32[32,1], index: 4, kind: input, shape index: {}]   ;;  %s2117_s5 = inlined_call_operand.vmem [shape: f32[32,1], index: 5, kind: input, shape index: {}]   ;;  %s2118_s6 = inlined_call_operand.vmem [shape: f32[32,32], index: 6, kind: input, shape index: {}]   ;;  %s2119_s7 = inlined_call_operand.vmem [shape: f32[32,1], index: 7, kind: input, shape index: {}]   ;;  %s2120_s8 = inlined_call_operand.vmem [shape: f32[32,1], index: 8, kind: input, shape index: {}]   ;;  %s2121_s9 = inlined_call_operand.vmem [shape: f32[32,1], index: 9, kind: input, shape index: {}]   ;;  %s2122_s10 = inlined_call_operand.<no memory space> [shape: f32[1,1], index: 10, kind: input, shape index: {}]   ;;  %s2123_s11 = inlined_call_operand.hbm [shape: f32[1,1024], index: 11, kind: output, shape index: {}]  }
   0x1   :  { %v16_v0 = vstv %s2122_s10 }
   0x2   :  { %17 = vst [vmem:[#allocation2] sm:$0x1] %v16_v0 }
   0x3   :  { %18 = vsyncpa [#allocation4], 0 }
   0x4   :  { %20 = vsyncpa [#allocation4 + $0x1], 0 }
   0x5   :  { %21 = vsyncpa [#allocation5], 0 }
   0x6   :  { %23 = vsyncpa [#allocation5 + $0x1], 0  ;;  %s1624_s19 = smov 0   ;;  %s1626_s20 = smov 0  }
   0x7   :  { %s1628_s21 = smov 0   ;;  %s1630_s22 = smov 0  }
   0x8 LB: > { %2128 = sst [smem:[#allocation9_spill]] %s1551_s21  ;;  %s1645_s10 = sadd.s32 4294967295, %s1555_s22   ;;  %s1555_s22 = sphi %s1630_s22, %s2138_s22   ;;  %s1551_s21 = sphi %s1628_s21, %s2140_s21   ;;  %s1547_s20 = sphi %s1626_s20, %s2142_s20   ;;  %s1543_s19 = sphi %s1624_s19, %s2141_s19  }
   0x9   : > { %s1248_s23 = sadd.s32 4294967294, %s1555_s22   ;;  %s1649_s24 = sadd.s32 1, %s1555_s22  }
   0xa   : > { %2129 = sst [smem:[#allocation10_spill]] %s1649_s24  ;;  %s36_s25 = sadd.s32 1, %s1551_s21 }
   0xb   : > { %s33_s26 = ssub.s32 %s1555_s22, %s1649_s24  ;;  %p43_p0 = scmp.ne.s32.totalorder %s1551_s21, %s1547_s20 }
   0xc   : > { %p34_p1 = scmp.eq.s32.totalorder %s33_s26, 0  ;;  %p44_p2 = scmp.eq.s32.totalorder %s1555_s22, 0 }
   0xd   : > { %p49_p3 = scmp.ne.s32.totalorder %s1547_s20, %s1543_s19  ;;  %p50_p4 = scmp.eq.s32.totalorder %s1645_s10, 0 }
   0xe   : > { %s1661_s27 = scalar_select %p34_p1, %s1551_s21, %s36_s25  }
   0xf   : > { %p1663_p5 = por %p44_p2, %p43_p0  ;;  %p1667_p6 = por %p50_p4, %p49_p3 }
  0x10   : > { %2130 = sst [smem:[#allocation11_spill]] %s1661_s27  ;;  %p283_p7 = scmp.eq.s32.totalorder %s1645_s10, 1 }
  0x11   : > { %p289_p8 = scmp.eq.s32.totalorder %s1248_s23, 1  ;;  %p1250_p9 = scmp.ge.s32.totalorder %s1555_s22, 2 }
  0x12   : > { %p1322_p10 = scmp.lt.s32.totalorder %s1555_s22, 2  ;;  %p1674_p11 = por %p283_p7, %p43_p0 }
  0x13   : > { %p1678_p12 = por %p289_p8, %p49_p3  ;;  %s339_s13 = sand.u32 1, %s1551_s21  }
  0x14   : > { %s1309_s14 = sshll.u32 %s1555_s22, 5  ;;  %s1251_s15 = sshll.u32 %s339_s13, 7 }
  0x15   : > { %s2134_s12 = scalar_select %p1678_p12, 1, 0 }
  0x16   : > { %s348_s18 = scalar_lea.hbm %s2112_s0, %s1309_s14  ;;  %s343_s26 = scalar_lea.vmem [#allocation3], %s1251_s15 }
  0x17   : > { %2135 = sst [smem:[#allocation12_spill]] %s2134_s12  ;;  %s349_s25 = sshll.u32 %s348_s18, 4  ;;  %s350_s25 = int_to_ptr.hbm [resolvable:$true] %s349_s25 }
  0x18   : > { %s351_s23 = sshll.u32 %s343_s26, 4  ;;  %p1689_p13 = pnand %p1322_p10, %p1663_p5  ;;  %s352_s23 = int_to_ptr.vmem [resolvable:$true] %s351_s23 }
  0x19   : > { %p1254_p0 = scmp.ge.s32.totalorder %s1555_s22, 1  ;;  %s340_s24 = scalar_lea.sflag [#allocation4], %s339_s13 }
  0x1a   : > { %s1459_s21 = sshra.s32 %s350_s25, 4  ;;  %p1463_p2 = pneg %p1689_p13  ;;  %s1460_s21 = int_to_ptr.hbm [resolvable:$true] %s1459_s21 }
  0x1b   : > { %s1461_s12 = scalar_lea.hbm %s1460_s21, 128  ;;  %s1466_s16 = scalar_lea.hbm %s2112_s0, 256 }
  0x1c   : > { %p1462_p1 = scmp.ne.s32.totalorder %s1460_s21, %s1461_s12  ;;  %p1467_p5 = scmp.lt.s32.totalorder %s1460_s21, %s2112_s0 }
  0x1d   : > { %p1468_p7 = scmp.lt.s32.totalorder %s1466_s16, %s1461_s12 }
  0x1e   : > { %p1464_p3 = pnand %p1463_p2, %p1462_p1 }
  0x1f   : > { %p1469_p8 = por %p1468_p7, %p1467_p5 }
  0x20   : > { %p1465_p4 = pneg %p1464_p3 }
  0x22   : > { %p1470_p10 = pnand %p1469_p8, %p1465_p4 }
  0x24   : > { %1473 = shalt.err (!%p1470_p10)
}
  0x25   : > { %s1557_s13 = smov 1024   ;;  %s1558_s18 = smov 512  }
  0x26   : > { %s1559_s26 = smov 32   ;;  %p359_p1 = scmp.lt.s32.totalorder %s1555_s22, 3 }
  0x27   : > { %1317 = dma.hbm_to_vmem [thread:$0]  (!%p1689_p13), %s350_s25, 2048, %s352_s23, %s340_s24, %s1557_s13, %s1558_s18, %s1559_s26  }
  0x28   : > { %p360_p2 = pnand %p1254_p0, %p359_p1 }
  0x29   : > { %s1708_s14 = sand.u32 (!%p360_p2), 1, %s1547_s20  }
  0x2a   : > { %363 = sbr.rel (%p360_p2) target bundleno = 603 (0x25b), region = 64  ;;  %s1255_s21 = sshll.u32 (!%p360_p2), %s1708_s14, 7 }
  0x2b   : > { %s366_s12 = scalar_lea.sflag (!%p360_p2), [#allocation4], %s1708_s14  ;;  %s1712_s15 = scalar_lea.vmem (!%p360_p2), [#allocation3], %s1255_s21 }
  0x2f   : > { %1534 = dma.done.wait (%p1667_p6), %s366_s12, 2048  }
  0x30   : > { %1536 = vsyncadd (%p1667_p6), %s366_s12, 4294965248  ;;  %v1560_v1 = vmov 0   ;;  %v434_v2 = vld [vmem:[%s2114_s2 + $0x18] sm:$0xff]  ;;  %v432_v3 = vld [vmem:[%s2114_s2 + $0x8] sm:$0xff]  ;;  %vm455_vm0 = vcmask 261120   ;;  %s1256_s25 = sshll.u32 %s1708_s14, 2 }
  0x31   : > { %1361 = vset.pattern.permute.xlu1 %v1560_v1  ;;  %1360 = vset.pattern.permute.xlu0 %v1560_v1  ;;  %v423_v4 = vld [vmem:[%s1712_s15 + $0x60] sm:$0xff]  ;;  %v424_v5 = vld [vmem:[%s1712_s15 + $0x68] sm:$0xff]  ;;  %v425_v6 = vld [vmem:[%s1712_s15 + $0x70] sm:$0xff]  ;;  %s1306_s23 = sshll.u32 %s1645_s10, 2  ;;  %vm1150_vm1 = vcmask 1040384   ;;  %vm1152_vm2 = vcmask 1042434  }
  0x32   : > { %1362 = vset.pattern.permute.xlu2 %v1560_v1  ;;  %452 = vperm.xlu0 %1360, %v434_v2   ;;  %v426_v7 = vld [vmem:[%s1712_s15 + $0x78] sm:$0xff]  ;;  %v419_v8 = vld [vmem:[%s1712_s15 + $0x40] sm:$0xff]  ;;  %v420_v9 = vld [vmem:[%s1712_s15 + $0x48] sm:$0xff]  ;;  %s1173_s28 = scalar_lea.hbm %s2123_s11, %s1306_s23  ;;  %s408_s17 = scalar_lea.vmem [#allocation6], %s1256_s25  ;;  %vm1154_vm3 = vcmask 1041408  }
  0x33   : > { %442 = vperm.xlu1 %1361, %v432_v3   ;;  %480 = vmatpush.msra.mxu0 %v423_v4  ;;  %v421_v10 = vld [vmem:[%s1712_s15 + $0x50] sm:$0xff]  ;;  %v422_v11 = vld [vmem:[%s1712_s15 + $0x58] sm:$0xff]  ;;  %v415_v12 = vld [vmem:[%s1712_s15 + $0x20] sm:$0xff]  ;;  %s1175_s13 = sshll.u32 %s408_s17, 4  ;;  %s1177_s10 = sshll.u32 %s1173_s28, 4  ;;  %s1176_s13 = int_to_ptr.vmem [resolvable:$true] %s1175_s13  ;;  %s1178_s10 = int_to_ptr.hbm [resolvable:$true] %s1177_s10 }
  0x34   : > { %509 = vmatpush.msra.mxu1 %v424_v5  ;;  %538 = vmatpush.msra.mxu2 %v425_v6  ;;  %v416_v13 = vld [vmem:[%s1712_s15 + $0x28] sm:$0xff]  ;;  %v417_v14 = vld [vmem:[%s1712_s15 + $0x30] sm:$0xff]  ;;  %v418_v15 = vld [vmem:[%s1712_s15 + $0x38] sm:$0xff]  ;;  %s1163_s18 = scalar_lea.sflag [#allocation5], %s1708_s14  ;;  %s1503_s26 = sshra.s32 %s1178_s10, 4  ;;  %s1504_s26 = int_to_ptr.hbm [resolvable:$true] %s1503_s26 }
  0x35   : > { %567 = vmatpush.msra.mxu3 %v426_v7  ;;  %481 = vmatpush.msra.mxu0 %v419_v8  ;;  %v411_v16 = vld [vmem:[%s1712_s15] sm:$0xff]  ;;  %v412_v17 = vld [vmem:[%s1712_s15 + $0x8] sm:$0xff]  ;;  %v413_v18 = vld [vmem:[%s1712_s15 + $0x10] sm:$0xff]  ;;  %s1505_s21 = scalar_lea.hbm %s1504_s26, 4  ;;  %s1509_s24 = scalar_lea.hbm %s2123_s11, 8 }
  0x36   : > { %510 = vmatpush.msra.mxu1 %v420_v9  ;;  %539 = vmatpush.msra.mxu2 %v421_v10  ;;  %v414_v19 = vld [vmem:[%s1712_s15 + $0x18] sm:$0xff]  ;;  %v433_v21 = vld [vmem:[%s2114_s2 + $0x10] sm:$0xff]  ;;  %v428_v23 = vld [vmem:[%s2113_s1 + $0x8] sm:$0xff]  ;;  %p1506_p6 = scmp.ne.s32.totalorder %s1504_s26, %s1505_s21  ;;  %p1510_p3 = scmp.lt.s32.totalorder %s1504_s26, %s2123_s11 }
  0x37   : > { %568 = vmatpush.msra.mxu3 %v422_v11  ;;  %482 = vmatpush.msra.mxu0 %v415_v12  ;;  %v427_v20 = vld [vmem:[%s2113_s1] sm:$0xff]  ;;  %v605_v24 = vld [vmem:[%s2116_s4 + $0x8] sm:$0xff]  ;;  %v429_v26 = vld [vmem:[%s2113_s1 + $0x10] sm:$0xff]  ;;  %p1511_p4 = scmp.lt.s32.totalorder %s1509_s24, %s1505_s21 }
  0x38   : > { %511 = vmatpush.msra.mxu1 %v416_v13  ;;  %540 = vmatpush.msra.mxu2 %v417_v14  ;;  %v431_v22 = vld [vmem:[%s2114_s2] sm:$0xff]  ;;  %v774_v27 = vld [vmem:[%s2117_s5 + $0x10] sm:$0xff]  ;;  %v773_v28 = vld [vmem:[%s2117_s5 + $0x8] sm:$0xff]  ;;  %p1507_p13 = pnand %p1506_p6, %p1674_p11 }
  0x39   : > { %569 = vmatpush.msra.mxu3 %v418_v15  ;;  %483 = vmatpush.msra.mxu0 %v411_v16  ;;  %v604_v25 = vld [vmem:[%s2116_s4] sm:$0xff]  ;;  %v430_v29 = vld [vmem:[%s2113_s1 + $0x18] sm:$0xff]  ;;  %v833_v31 = vld [vmem:[%s2119_s7 + $0x8] sm:$0xff]  ;;  %p1512_p5 = por %p1511_p4, %p1510_p3 }
  0x3a   : > { %512 = vmatpush.msra.mxu1 %v412_v17  ;;  %541 = vmatpush.msra.mxu2 %v413_v18  ;;  %v832_v30 = vld [vmem:[%s2119_s7] sm:$0xff]  ;;  %v835_v32 = vld [vmem:[%s2119_s7 + $0x18] sm:$0xff]  ;;  %v1002_v34 = vld [vmem:[%s2120_s8 + $0x10] sm:$0xff]  ;;  %p1508_p0 = pneg %p1507_p13 }
  0x3b   : > { %570 = vmatpush.msra.mxu3 %v414_v19  ;;  %1257 = vmatmul.msk.f32.vlgmr.msra.gmra.mxu0 %vm455_vm0, %v427_v20  ;;  %v1000_v33 = vld [vmem:[%s2120_s8] sm:$0xff]  ;;  %v1003_v35 = vld [vmem:[%s2120_s8 + $0x18] sm:$0xff]  ;;  %v1057_v36 = vld [vmem:[%s2121_s9 + $0x8] sm:$0xff] }
  0x3c   : > { %1261 = vmatmul.msk.f32.vlgmr.msra.gmra.mxu1 %vm455_vm0, %v427_v20  ;;  %1265 = vmatmul.msk.f32.vlgmr.msra.gmra.mxu2 %vm455_vm0, %v427_v20  ;;  %v1058_v37 = vld [vmem:[%s2121_s9 + $0x10] sm:$0xff]  ;;  %v1060_v38 = vld [vmem:[#allocation2] sm:$0x1]  ;;  %v607_v51 = vld [vmem:[%s2116_s4 + $0x18] sm:$0xff]  ;;  %p1513_p7 = pnand %p1512_p5, %p1508_p0 }
  0x3d   : > { %1269 = vmatmul.msk.f32.vlgmr.msra.gmra.mxu3 %vm455_vm0, %v427_v20  ;;  %447 = vperm.xlu0 %1360, %v433_v21   ;;  %v606_v59 = vld [vmem:[%s2116_s4 + $0x10] sm:$0xff]  ;;  %v775_v9 = vld [vmem:[%s2117_s5 + $0x18] sm:$0xff] }
  0x3e   : > { %437 = vperm.xlu1 %1361, %v431_v22   ;;  %625 = vperm.xlu2 %1362, %v607_v51  }
  0x43   : > { %1258 = vmatmul.msk.f32.gmra.mxu0 %vm455_vm0, %v428_v23 }
  0x44   : > { %1262 = vmatmul.msk.f32.gmra.mxu1 %vm455_vm0, %v428_v23  ;;  %1266 = vmatmul.msk.f32.gmra.mxu2 %vm455_vm0, %v428_v23 }
  0x45   : > { %1270 = vmatmul.msk.f32.gmra.mxu3 %vm455_vm0, %v428_v23  ;;  %615 = vperm.xlu0 %1360, %v605_v24   ;;  %v600_v23 = vld [vmem:[%s2115_s3] sm:$0xff] }
  0x46   : > { %610 = vperm.xlu1 %1361, %v604_v25   ;;  %620 = vperm.xlu2 %1362, %v606_v59  }
  0x4b   : > { %1259 = vmatmul.msk.f32.gmra.mxu0 %vm455_vm0, %v429_v26 }
  0x4c   : > { %1263 = vmatmul.msk.f32.gmra.mxu1 %vm455_vm0, %v429_v26  ;;  %1267 = vmatmul.msk.f32.gmra.mxu2 %vm455_vm0, %v429_v26 }
  0x4d   : > { %1271 = vmatmul.msk.f32.gmra.mxu3 %vm455_vm0, %v429_v26  ;;  %788 = vperm.xlu0 %1360, %v774_v27   ;;  %v772_v26 = vld [vmem:[%s2117_s5] sm:$0xff] }
  0x4e   : > { %783 = vperm.xlu1 %1361, %v773_v28   ;;  %793 = vperm.xlu2 %1362, %v775_v9  }
  0x53   : > { %1260 = vmatmul.msk.f32.gmra.mxu0 %vm455_vm0, %v430_v29 }
  0x54   : > { %1264 = vmatmul.msk.f32.gmra.mxu1 %vm455_vm0, %v430_v29  ;;  %1268 = vmatmul.msk.f32.gmra.mxu2 %vm455_vm0, %v430_v29 }
  0x55   : > { %1272 = vmatmul.msk.f32.gmra.mxu3 %vm455_vm0, %v430_v29  ;;  %838 = vperm.xlu0 %1360, %v832_v30  }
  0x56   : > { %843 = vperm.xlu1 %1361, %v833_v31   ;;  %778 = vperm.xlu2 %1362, %v772_v26  }
  0x5d   : > { %853 = vperm.xlu0 %1360, %v835_v32   ;;  %v601_v32 = vld [vmem:[%s2115_s3 + $0x8] sm:$0xff] }
  0x5e   : > { %1006 = vperm.xlu1 %1361, %v1000_v33   ;;  %v834_v33 = vld [vmem:[%s2119_s7 + $0x10] sm:$0xff] }
  0x5f   : > { %848 = vperm.xlu2 %1362, %v834_v33  }
  0x65   : > { %1016 = vperm.xlu0 %1360, %v1002_v34   ;;  %v602_v34 = vld [vmem:[%s2115_s3 + $0x10] sm:$0xff] }
  0x66   : > { %1021 = vperm.xlu1 %1361, %v1003_v35   ;;  %v1001_v35 = vld [vmem:[%s2120_s8 + $0x8] sm:$0xff] }
  0x67   : > { %1011 = vperm.xlu2 %1362, %v1001_v35  }
  0x6d   : > { %1068 = vperm.xlu0 %1360, %v1057_v36   ;;  %v603_v36 = vld [vmem:[%s2115_s3 + $0x18] sm:$0xff] }
  0x6e   : > { %1073 = vperm.xlu1 %1361, %v1058_v37   ;;  %v1056_v37 = vld [vmem:[%s2121_s9] sm:$0xff] }
  0x6f   : > { %1063 = vperm.xlu2 %1362, %v1056_v37  }
  0x75   : > { %1135 = vperm.xlu0 %1360, %v1060_v38   ;;  %v1059_v38 = vld [vmem:[%s2121_s9 + $0x18] sm:$0xff] }
  0x77   : > { %1078 = vperm.xlu2 %1362, %v1059_v38  }
  0xa4   : > { %v453_v46 = vpop.permute.xlu0 %452 }
  0xa5   : > { %v443_v45 = vpop.permute.xlu1 %442 }
  0xaf   : > { %v448_v60 = vpop.permute.xlu0 %447 }
  0xb0   : > { %v438_v52 = vpop.permute.xlu1 %437 }
  0xb8   : > { %v485_v39 = vpop.f32.mrf.mxu0 }
  0xb9   : > { %v514_v40 = vpop.f32.mrf.mxu1  ;;  %v486_v53 = vadd.f32 %v485_v39, %v438_v52 }
  0xba   : > { %v515_v1 = vadd.f32 %v514_v40, %v438_v52 }
  0xbb   : > { %1363 = vtanh.f32 %v486_v53 }
  0xbf   : > { %v543_v41 = vpop.f32.mrf.mxu2 }
  0xc0   : > { %v572_v42 = vpop.f32.mrf.mxu3  ;;  %v488_v43 = vpop.f32.mrf.mxu0  ;;  %v544_v17 = vadd.f32 %v543_v41, %v438_v52 }
  0xc1   : > { %v517_v44 = vpop.f32.mrf.mxu1  ;;  %v489_v54 = vadd.f32 %v488_v43, %v443_v45  ;;  %v1816_v5 = vpop.eup %1363  ;;  %v573_v19 = vadd.f32 %v572_v42, %v438_v52 }
  0xc2   : > { %v518_v2 = vadd.f32 %v517_v44, %v443_v45  ;;  %v626_v41 = vpop.permute.xlu2 %625 }
  0xc3   : > { %1365 = vtanh.f32 %v489_v54 }
  0xc7   : > { %v546_v47 = vpop.f32.mrf.mxu2 }
  0xc8   : > { %v575_v48 = vpop.f32.mrf.mxu3  ;;  %v491_v49 = vpop.f32.mrf.mxu0  ;;  %v547_v13 = vadd.f32 %v546_v47, %v443_v45 }
  0xc9   : > { %v520_v50 = vpop.f32.mrf.mxu1  ;;  %v492_v63 = vadd.f32 %v491_v49, %v448_v60  ;;  %v1821_v10 = vpop.eup %1365  ;;  %v576_v15 = vadd.f32 %v575_v48, %v443_v45 }
  0xca   : > { %v521_v0 = vadd.f32 %v520_v50, %v448_v60  ;;  %v621_v48 = vpop.permute.xlu2 %620  ;;  %v616_v49 = vpop.permute.xlu0 %615 }
  0xcf   : > { %v549_v55 = vpop.f32.mrf.mxu2 }
  0xd0   : > { %v578_v56 = vpop.f32.mrf.mxu3  ;;  %v494_v57 = vpop.f32.mrf.mxu0  ;;  %v550_v6 = vadd.f32 %v549_v55, %v448_v60 }
  0xd1   : > { %v523_v58 = vpop.f32.mrf.mxu1  ;;  %v495_v61 = vadd.f32 %v494_v57, %v453_v46  ;;  %v579_v11 = vadd.f32 %v578_v56, %v448_v60  ;;  %v611_v56 = vpop.permute.xlu1 %610 }
  0xd2   : > { %v524_v62 = vadd.f32 %v523_v58, %v453_v46 }
  0xd3   : > { %1367 = vtanh.f32 %v495_v61 }
  0xd4   : > { %1369 = vtanh.f32 %v524_v62 }
  0xd5   : > { %1371 = vtanh.f32 %v492_v63  ;;  %v1910_v63 = vpop.permute.xlu2 %793 }
  0xd6   : > { %1373 = vtanh.f32 %v521_v0 }
  0xd7   : > { %v552_v3 = vpop.f32.mrf.mxu2  ;;  %1375 = vtanh.f32 %v515_v1 }
  0xd8   : > { %v581_v4 = vpop.f32.mrf.mxu3  ;;  %v553_v7 = vadd.f32 %v552_v3, %v453_v46  ;;  %1377 = vtanh.f32 %v518_v2 }
  0xd9   : > { %v582_v8 = vadd.f32 %v581_v4, %v453_v46  ;;  %v1823_v12 = vpop.eup %1367 }
  0xda   : > { %1379 = vtanh.f32 %v553_v7  ;;  %v1825_v14 = vpop.eup %1369  ;;  %652 = vmatpush.msrb.mxu0 %v1823_v12 }
  0xdb   : > { %1381 = vtanh.f32 %v582_v8  ;;  %v1828_v16 = vpop.eup %1371  ;;  %681 = vmatpush.msrb.mxu1 %v1825_v14 }
  0xdc   : > { %1383 = vtanh.f32 %v550_v6  ;;  %v1831_v18 = vpop.eup %1373  ;;  %653 = vmatpush.msrb.mxu0 %v1828_v16 }
  0xdd   : > { %1385 = vtanh.f32 %v579_v11  ;;  %v1834_v20 = vpop.eup %1375  ;;  %682 = vmatpush.msrb.mxu1 %v1831_v18  ;;  %v789_v11 = vpop.permute.xlu0 %788 }
  0xde   : > { %1387 = vtanh.f32 %v547_v13  ;;  %v1837_v21 = vpop.eup %1377  ;;  %654 = vmatpush.msrb.mxu0 %v1821_v10 }
  0xdf   : > { %1389 = vtanh.f32 %v576_v15  ;;  %683 = vmatpush.msrb.mxu1 %v1837_v21 }
  0xe0   : > { %v1840_v22 = vpop.eup %1379  ;;  %1391 = vtanh.f32 %v544_v17  ;;  %655 = vmatpush.msrb.mxu0 %v1816_v5 }
  0xe1   : > { %v1846_v24 = vpop.eup %1381  ;;  %1393 = vtanh.f32 %v573_v19  ;;  %710 = vmatpush.msrb.mxu2 %v1840_v22  ;;  %684 = vmatpush.msrb.mxu1 %v1834_v20 }
  0xe2   : > { %v1850_v25 = vpop.eup %1383  ;;  %739 = vmatpush.msrb.mxu3 %v1846_v24  ;;  %1273 = vmatmul.msk.f32.vlgmr.msrb.gmra.mxu0 %vm455_vm0, %v600_v23 }
  0xe3   : > { %v1857_v27 = vpop.eup %1385  ;;  %1277 = vmatmul.msk.f32.vlgmr.msrb.gmra.mxu1 %vm455_vm0, %v600_v23  ;;  %711 = vmatpush.msrb.mxu2 %v1850_v25 }
  0xe4   : > { %v1861_v28 = vpop.eup %1387  ;;  %740 = vmatpush.msrb.mxu3 %v1857_v27 }
  0xe5   : > { %v1865_v29 = vpop.eup %1389  ;;  %712 = vmatpush.msrb.mxu2 %v1861_v28 }
  0xe6   : > { %v1867_v30 = vpop.eup %1391  ;;  %741 = vmatpush.msrb.mxu3 %v1865_v29 }
  0xe7   : > { %v1871_v31 = vpop.eup %1393  ;;  %713 = vmatpush.msrb.mxu2 %v1867_v30 }
  0xe8   : > { %742 = vmatpush.msrb.mxu3 %v1871_v31  ;;  %1281 = vmatmul.msk.f32.vlgmr.msrb.gmra.mxu2 %vm455_vm0, %v600_v23 }
  0xe9   : > { %1285 = vmatmul.msk.f32.vlgmr.msrb.gmra.mxu3 %vm455_vm0, %v600_v23 }
  0xea   : > { %1274 = vmatmul.msk.f32.gmra.mxu0 %vm455_vm0, %v601_v32 }
  0xeb   : > { %1278 = vmatmul.msk.f32.gmra.mxu1 %vm455_vm0, %v601_v32 }
  0xf0   : > { %1282 = vmatmul.msk.f32.gmra.mxu2 %vm455_vm0, %v601_v32 }
  0xf1   : > { %1286 = vmatmul.msk.f32.gmra.mxu3 %vm455_vm0, %v601_v32  ;;  %v784_v32 = vpop.permute.xlu1 %783 }
  0xf2   : > { %1275 = vmatmul.msk.f32.gmra.mxu0 %vm455_vm0, %v602_v34 }
  0xf3   : > { %1279 = vmatmul.msk.f32.gmra.mxu1 %vm455_vm0, %v602_v34 }
  0xf8   : > { %1283 = vmatmul.msk.f32.gmra.mxu2 %vm455_vm0, %v602_v34 }
  0xf9   : > { %1287 = vmatmul.msk.f32.gmra.mxu3 %vm455_vm0, %v602_v34 }
  0xfa   : > { %1276 = vmatmul.msk.f32.gmra.mxu0 %vm455_vm0, %v603_v36 }
  0xfb   : > { %1280 = vmatmul.msk.f32.gmra.mxu1 %vm455_vm0, %v603_v36 }
 0x100   : > { %1284 = vmatmul.msk.f32.gmra.mxu2 %vm455_vm0, %v603_v36 }
 0x101   : > { %1288 = vmatmul.msk.f32.gmra.mxu3 %vm455_vm0, %v603_v36 }
 0x15f   : > { %v657_v39 = vpop.f32.mrf.mxu0 }
 0x160   : > { %v686_v40 = vpop.f32.mrf.mxu1  ;;  %v658_v59 = vadd.f32 %v657_v39, %v611_v56 }
 0x161   : > { %v687_v62 = vadd.f32 %v686_v40, %v611_v56 }
 0x167   : > { %v660_v42 = vpop.f32.mrf.mxu0 }
 0x168   : > { %v689_v43 = vpop.f32.mrf.mxu1  ;;  %v661_v50 = vadd.f32 %v660_v42, %v616_v49 }
 0x169   : > { %v690_v51 = vadd.f32 %v689_v43, %v616_v49  ;;  %v779_v43 = vpop.permute.xlu2 %778 }
 0x16a   : > { %1395 = vtanh.f32 %v661_v50 }
 0x16b   : > { %v715_v44 = vpop.f32.mrf.mxu2  ;;  %1397 = vtanh.f32 %v690_v51 }
 0x16c   : > { %v744_v45 = vpop.f32.mrf.mxu3  ;;  %v716_v33 = vadd.f32 %v715_v44, %v611_v56 }
 0x16d   : > { %v745_v44 = vadd.f32 %v744_v45, %v611_v56 }
 0x16f   : > { %v663_v46 = vpop.f32.mrf.mxu0 }
 0x170   : > { %v692_v47 = vpop.f32.mrf.mxu1  ;;  %v664_v54 = vadd.f32 %v663_v46, %v621_v48  ;;  %v1396_v2 = vpop.eup %1395 }
 0x171   : > { %v693_v55 = vadd.f32 %v692_v47, %v621_v48  ;;  %v1398_v3 = vpop.eup %1397  ;;  %v800_v40 = vmul.f32 %v1396_v2, %v784_v32  ;;  %v829_v2 = vld [vmem:[%s2118_s6 + $0x8] sm:$0xff] }
 0x172   : > { %1399 = vtanh.f32 %v664_v54  ;;  %v801_v42 = vmul.f32 %v1398_v3, %v784_v32 }
 0x173   : > { %v718_v52 = vpop.f32.mrf.mxu2  ;;  %1401 = vtanh.f32 %v693_v55 }
 0x174   : > { %v747_v53 = vpop.f32.mrf.mxu3  ;;  %v719_v6 = vadd.f32 %v718_v52, %v616_v49  ;;  %v828_v52 = vld [vmem:[%s2118_s6] sm:$0xff] }
 0x175   : > { %v748_v8 = vadd.f32 %v747_v53, %v616_v49 }
 0x177   : > { %v666_v57 = vpop.f32.mrf.mxu0 }
 0x178   : > { %v695_v58 = vpop.f32.mrf.mxu1  ;;  %v667_v60 = vadd.f32 %v666_v57, %v626_v41  ;;  %v1400_v4 = vpop.eup %1399 }
 0x179   : > { %v696_v61 = vadd.f32 %v695_v58, %v626_v41  ;;  %v1402_v7 = vpop.eup %1401  ;;  %v804_v23 = vmul.f32 %v1400_v4, %v789_v11 }
 0x17a   : > { %1403 = vtanh.f32 %v667_v60  ;;  %v805_v35 = vmul.f32 %v1402_v7, %v789_v11  ;;  %v844_v7 = vpop.permute.xlu1 %843 }
 0x17b   : > { %1405 = vtanh.f32 %v696_v61  ;;  %v721_v0 = vpop.f32.mrf.mxu2  ;;  %v1922_v49 = vadd.f32 %v1828_v16, %v804_v23  ;;  %v1934_v16 = vadd.f32 %v1837_v21, %v801_v42 }
 0x17c   : > { %v750_v1 = vpop.f32.mrf.mxu3  ;;  %1407 = vtanh.f32 %v658_v59  ;;  %v722_v13 = vadd.f32 %v721_v0, %v621_v48 }
 0x17d   : > { %1409 = vtanh.f32 %v687_v62  ;;  %v751_v19 = vadd.f32 %v750_v1, %v621_v48 }
 0x17e   : > { %1411 = vtanh.f32 %v719_v6  ;;  %v839_v6 = vpop.permute.xlu0 %838 }
 0x17f   : > { %1413 = vtanh.f32 %v748_v8  ;;  %v2008_v8 = vpop.permute.xlu2 %848 }
 0x180   : > { %v1404_v9 = vpop.eup %1403  ;;  %1415 = vtanh.f32 %v722_v13 }
 0x181   : > { %v1406_v15 = vpop.eup %1405  ;;  %v808_v17 = vmul.f32 %v1404_v9, %v1910_v63  ;;  %1417 = vtanh.f32 %v751_v19 }
 0x182   : > { %v1408_v26 = vpop.eup %1407  ;;  %v809_v34 = vmul.f32 %v1406_v15, %v1910_v63  ;;  %v2012_v19 = vpop.permute.xlu1 %1006 }
 0x183   : > { %v1410_v36 = vpop.eup %1409  ;;  %v724_v37 = vpop.f32.mrf.mxu2  ;;  %v1915_v39 = vadd.f32 %v1823_v12, %v808_v17  ;;  %v796_v50 = vmul.f32 %v1408_v26, %v779_v43  ;;  %v1926_v12 = vadd.f32 %v1831_v18, %v805_v35 }
 0x184   : > { %v753_v38 = vpop.f32.mrf.mxu3  ;;  %v725_v46 = vadd.f32 %v724_v37, %v626_v41  ;;  %v1918_v48 = vadd.f32 %v1825_v14, %v809_v34  ;;  %v797_v51 = vmul.f32 %v1410_v36, %v779_v43  ;;  %v1930_v14 = vadd.f32 %v1821_v10, %v800_v40 }
 0x185   : > { %v754_v47 = vadd.f32 %v753_v38, %v626_v41  ;;  %880 = vmatpush.msra.mxu0 %v1915_v39  ;;  %v1412_v41 = vpop.eup %1411  ;;  %v1938_v18 = vadd.f32 %v1816_v5, %v796_v50 }
 0x186   : > { %1419 = vtanh.f32 %v725_v46  ;;  %909 = vmatpush.msra.mxu1 %v1918_v48  ;;  %v1414_v45 = vpop.eup %1413  ;;  %v1945_v53 = vadd.f32 %v1834_v20, %v797_v51  ;;  %v802_v61 = vmul.f32 %v1412_v41, %v784_v32  ;;  %v2010_v13 = vpop.permute.xlu0 %853 }
 0x187   : > { %1421 = vtanh.f32 %v754_v47  ;;  %881 = vmatpush.msra.mxu0 %v1922_v49  ;;  %v1416_v10 = vpop.eup %1415  ;;  %v803_v0 = vmul.f32 %v1414_v45, %v784_v32 }
 0x188   : > { %1423 = vtanh.f32 %v716_v33  ;;  %910 = vmatpush.msra.mxu1 %v1926_v12  ;;  %v1418_v54 = vpop.eup %1417  ;;  %v806_v56 = vmul.f32 %v1416_v10, %v789_v11  ;;  %v2014_v33 = vpop.permute.xlu2 %1011 }
 0x189   : > { %1425 = vtanh.f32 %v745_v44  ;;  %882 = vmatpush.msra.mxu0 %v1930_v14  ;;  %v807_v59 = vmul.f32 %v1418_v54, %v789_v11 }
 0x18a   : > { %911 = vmatpush.msra.mxu1 %v1934_v16  ;;  %v1961_v1 = vadd.f32 %v1850_v25, %v806_v56  ;;  %v1977_v25 = vadd.f32 %v1865_v29, %v803_v0  ;;  %v831_v29 = vld [vmem:[%s2118_s6 + $0x18] sm:$0xff]  ;;  %v2020_v46 = vpop.permute.xlu1 %1021 }
 0x18b   : > { %883 = vmatpush.msra.mxu0 %v1938_v18 }
 0x18c   : > { %v1420_v21 = vpop.eup %1419  ;;  %912 = vmatpush.msra.mxu1 %v1945_v53  ;;  %1289 = vmatmul.msk.f32.vlgmr.msra.gmra.mxu0 %vm455_vm0, %v828_v52 }
 0x18d   : > { %v1422_v5 = vpop.eup %1421  ;;  %v810_v55 = vmul.f32 %v1420_v21, %v1910_v63  ;;  %1293 = vmatmul.msk.f32.vlgmr.msra.gmra.mxu1 %vm455_vm0, %v828_v52 }
 0x18e   : > { %v1424_v57 = vpop.eup %1423  ;;  %v811_v58 = vmul.f32 %v1422_v5, %v1910_v63  ;;  %v2018_v42 = vpop.permute.xlu0 %1016 }
 0x18f   : > { %v1426_v20 = vpop.eup %1425  ;;  %v1954_v60 = vadd.f32 %v1840_v22, %v810_v55  ;;  %v798_v63 = vmul.f32 %v1424_v57, %v779_v43  ;;  %v1968_v22 = vadd.f32 %v1857_v27, %v807_v59 }
 0x190   : > { %v1957_v62 = vadd.f32 %v1846_v24, %v811_v58  ;;  %v799_v3 = vmul.f32 %v1426_v20, %v779_v43  ;;  %v1972_v24 = vadd.f32 %v1861_v28, %v802_v61  ;;  %v830_v28 = vld [vmem:[%s2118_s6 + $0x10] sm:$0xff]  ;;  %v2027_v56 = vpop.permute.xlu2 %1063 }
 0x191   : > { %938 = vmatpush.msra.mxu2 %v1954_v60  ;;  %v1982_v27 = vadd.f32 %v1867_v30, %v798_v63 }
 0x192   : > { %967 = vmatpush.msra.mxu3 %v1957_v62  ;;  %v1986_v4 = vadd.f32 %v1871_v31, %v799_v3 }
 0x193   : > { %939 = vmatpush.msra.mxu2 %v1961_v1 }
 0x194   : > { %968 = vmatpush.msra.mxu3 %v1968_v22  ;;  %1290 = vmatmul.msk.f32.gmra.mxu0 %vm455_vm0, %v829_v2 }
 0x195   : > { %1294 = vmatmul.msk.f32.gmra.mxu1 %vm455_vm0, %v829_v2  ;;  %940 = vmatpush.msra.mxu2 %v1972_v24 }
 0x196   : > { %969 = vmatpush.msra.mxu3 %v1977_v25 }
 0x197   : > { %941 = vmatpush.msra.mxu2 %v1982_v27 }
 0x198   : > { %970 = vmatpush.msra.mxu3 %v1986_v4  ;;  %1297 = vmatmul.msk.f32.vlgmr.msra.gmra.mxu2 %vm455_vm0, %v828_v52 }
 0x199   : > { %1301 = vmatmul.msk.f32.vlgmr.msra.gmra.mxu3 %vm455_vm0, %v828_v52 }
 0x19c   : > { %1291 = vmatmul.msk.f32.gmra.mxu0 %vm455_vm0, %v830_v28 }
 0x19d   : > { %1295 = vmatmul.msk.f32.gmra.mxu1 %vm455_vm0, %v830_v28 }
 0x1a0   : > { %1298 = vmatmul.msk.f32.gmra.mxu2 %vm455_vm0, %v829_v2 }
 0x1a1   : > { %1302 = vmatmul.msk.f32.gmra.mxu3 %vm455_vm0, %v829_v2 }
 0x1a4   : > { %1292 = vmatmul.msk.f32.gmra.mxu0 %vm455_vm0, %v831_v29 }
 0x1a5   : > { %1296 = vmatmul.msk.f32.gmra.mxu1 %vm455_vm0, %v831_v29 }
 0x1a8   : > { %1299 = vmatmul.msk.f32.gmra.mxu2 %vm455_vm0, %v830_v28 }
 0x1a9   : > { %1303 = vmatmul.msk.f32.gmra.mxu3 %vm455_vm0, %v830_v28  ;;  %v2033_v28 = vpop.permute.xlu0 %1068 }
 0x1b0   : > { %1300 = vmatmul.msk.f32.gmra.mxu2 %vm455_vm0, %v831_v29 }
 0x1b1   : > { %1304 = vmatmul.msk.f32.gmra.mxu3 %vm455_vm0, %v831_v29 }
 0x209   : > { %v885_v30 = vpop.f32.mrf.mxu0 }
 0x20a   : > { %v914_v31 = vpop.f32.mrf.mxu1  ;;  %v886_v36 = vadd.f32 %v885_v30, %v839_v6 }
 0x20b   : > { %v915_v17 = vadd.f32 %v914_v31, %v839_v6 }
 0x211   : > { %v888_v9 = vpop.f32.mrf.mxu0 }
 0x212   : > { %v917_v11 = vpop.f32.mrf.mxu1  ;;  %v889_v26 = vadd.f32 %v888_v9, %v844_v7  ;;  %v2038_v9 = vpop.permute.xlu1 %1073 }
 0x213   : > { %v918_v15 = vadd.f32 %v917_v11, %v844_v7 }
 0x215   : > { %1427 = vtanh.f32 %v918_v15 }
 0x216   : > { %1429 = vtanh.f32 %v915_v17 }
 0x219   : > { %v891_v23 = vpop.f32.mrf.mxu0 }
 0x21a   : > { %v920_v32 = vpop.f32.mrf.mxu1  ;;  %v892_v38 = vadd.f32 %v891_v23, %v2008_v8 }
 0x21b   : > { %v921_v34 = vadd.f32 %v920_v32, %v2008_v8  ;;  %v943_v35 = vpop.f32.mrf.mxu2  ;;  %v1428_v40 = vpop.eup %1427 }
 0x21c   : > { %v972_v37 = vpop.f32.mrf.mxu3  ;;  %v1430_v43 = vpop.eup %1429  ;;  %v1029_v44 = vmul.f32 %v1428_v40, %v2014_v33  ;;  %v944_v5 = vadd.f32 %v943_v35, %v839_v6 }
 0x21d   : > { %1431 = vtanh.f32 %v921_v34  ;;  %v1025_v45 = vmul.f32 %v1430_v43, %v2012_v19  ;;  %v973_v57 = vadd.f32 %v972_v37, %v839_v6  ;;  %v1079_v40 = vpop.permute.xlu2 %1078 }
 0x21e   : > { %1433 = vtanh.f32 %v889_v26  ;;  %v1045_v59 = vadd.f32 %v1029_v44, %v1934_v16 }
 0x21f   : > { %1435 = vtanh.f32 %v886_v36  ;;  %v1041_v0 = vadd.f32 %v1025_v45, %v1945_v53 }
 0x220   : > { %1437 = vtanh.f32 %v892_v38  ;;  %v1086_v31 = vmul.f32 %v2033_v28, %v1045_v59 }
 0x221   : > { %v894_v47 = vpop.f32.mrf.mxu0  ;;  %v1082_v53 = vmul.f32 %v2027_v56, %v1041_v0 }
 0x222   : > { %v895_v50 = vadd.f32 %v894_v47, %v2010_v13  ;;  %v923_v51 = vpop.f32.mrf.mxu1 }
 0x223   : > { %v1432_v41 = vpop.eup %1431  ;;  %v924_v52 = vadd.f32 %v923_v51, %v2010_v13  ;;  %v946_v10 = vpop.f32.mrf.mxu2  ;;  %v1106_v36 = vadd.f32 %v1086_v31, %v1082_v53 }
 0x224   : > { %v1434_v54 = vpop.eup %1433  ;;  %v1033_v21 = vmul.f32 %v1432_v41, %v2018_v42  ;;  %1439 = vtanh.f32 %v895_v50  ;;  %v975_v55 = vpop.f32.mrf.mxu3  ;;  %v947_v20 = vadd.f32 %v946_v10, %v844_v7 }
 0x225   : > { %1441 = vtanh.f32 %v924_v52  ;;  %v1436_v58 = vpop.eup %1435  ;;  %v1028_v2 = vmul.f32 %v1434_v54, %v2014_v33  ;;  %v976_v63 = vadd.f32 %v975_v55, %v844_v7 }
 0x226   : > { %v1438_v61 = vpop.eup %1437  ;;  %v1049_v3 = vadd.f32 %v1033_v21, %v1926_v12  ;;  %1443 = vtanh.f32 %v944_v5  ;;  %v1024_v29 = vmul.f32 %v1436_v58, %v2012_v19 }
 0x227   : > { %1445 = vtanh.f32 %v973_v57  ;;  %v1032_v16 = vmul.f32 %v1438_v61, %v2018_v42  ;;  %v1044_v7 = vadd.f32 %v1028_v2, %v1930_v14 }
 0x228   : > { %1447 = vtanh.f32 %v947_v20  ;;  %v1090_v11 = vmul.f32 %v2038_v9, %v1049_v3  ;;  %v1040_v32 = vadd.f32 %v1024_v29, %v1938_v18 }
 0x229   : > { %1449 = vtanh.f32 %v976_v63  ;;  %v1048_v37 = vadd.f32 %v1032_v16, %v1922_v49  ;;  %v1085_v47 = vmul.f32 %v2033_v28, %v1044_v7 }
 0x22a   : > { %v1440_v30 = vpop.eup %1439  ;;  %v1107_v44 = vadd.f32 %v1106_v36, %v1090_v11 }
 0x22b   : > { %v1442_v6 = vpop.eup %1441  ;;  %v949_v12 = vpop.f32.mrf.mxu2  ;;  %v1036_v15 = vmul.f32 %v1440_v30, %v2020_v46  ;;  %v1089_v41 = vmul.f32 %v2038_v9, %v1048_v37 }
 0x22c   : > { %v1037_v17 = vmul.f32 %v1442_v6, %v2020_v46  ;;  %v950_v23 = vadd.f32 %v949_v12, %v2008_v8  ;;  %v978_v26 = vpop.f32.mrf.mxu3  ;;  %v1444_v35 = vpop.eup %1443 }
 0x22d   : > { %v979_v34 = vadd.f32 %v978_v26, %v2008_v8  ;;  %v1446_v38 = vpop.eup %1445  ;;  %v1052_v50 = vadd.f32 %v1036_v15, %v1915_v39  ;;  %v1081_v8 = vmul.f32 %v2027_v56, %v1040_v32  ;;  %v1026_v39 = vmul.f32 %v1444_v35, %v2012_v19 }
 0x22e   : > { %v1053_v14 = vadd.f32 %v1037_v17, %v1918_v48  ;;  %1451 = vtanh.f32 %v950_v23  ;;  %v1448_v43 = vpop.eup %1447  ;;  %v1027_v58 = vmul.f32 %v1446_v38, %v2012_v19 }
 0x22f   : > { %1453 = vtanh.f32 %v979_v34  ;;  %v1450_v18 = vpop.eup %1449  ;;  %v1030_v49 = vmul.f32 %v1448_v43, %v2014_v33  ;;  %v1097_v10 = vadd.f32 %v1085_v47, %v1081_v8  ;;  %v1093_v54 = vmul.f32 %v1079_v40, %v1052_v50 }
 0x230   : > { %v1094_v51 = vmul.f32 %v1079_v40, %v1053_v14  ;;  %v1031_v21 = vmul.f32 %v1450_v18, %v2014_v33  ;;  %v1042_v29 = vadd.f32 %v1026_v39, %v1982_v27  ;;  %v1043_v19 = vadd.f32 %v1027_v58, %v1986_v4 }
 0x231   : > { %v1098_v61 = vadd.f32 %v1097_v10, %v1089_v41  ;;  %v1046_v63 = vadd.f32 %v1030_v49, %v1972_v24 }
 0x232   : > { %v1108_v45 = vadd.f32 %v1107_v44, %v1094_v51  ;;  %v1047_v3 = vadd.f32 %v1031_v21, %v1977_v25  ;;  %v1083_v7 = vmul.f32 %v2027_v56, %v1042_v29  ;;  %v1136_v44 = vpop.permute.xlu0 %1135 }
 0x233   : > { %v952_v48 = vpop.f32.mrf.mxu2  ;;  %v1099_v33 = vadd.f32 %v1098_v61, %v1093_v54  ;;  %v1087_v16 = vmul.f32 %v2033_v28, %v1046_v63  ;;  %v1138_v8 = vperm.slane %v1136_v44, 0 }
 0x234   : > { %v1452_v52 = vpop.eup %1451  ;;  %v953_v5 = vadd.f32 %v952_v48, %v2010_v13  ;;  %v981_v55 = vpop.f32.mrf.mxu3  ;;  %v1109_v0 = vrot.slane %v1108_v45, 4  ;;  %v1088_v53 = vmul.f32 %v2033_v28, %v1047_v3 }
 0x235   : > { %v1454_v57 = vpop.eup %1453  ;;  %v1034_v59 = vmul.f32 %v1452_v52, %v2018_v42  ;;  %v982_v20 = vadd.f32 %v981_v55, %v2010_v13  ;;  %v1115_v11 = vadd.f32 %v1087_v16, %v1083_v7 }
 0x236   : > { %v1035_v2 = vmul.f32 %v1454_v57, %v2018_v42  ;;  %1455 = vtanh.f32 %v953_v5  ;;  %v1110_v31 = vadd.f32 %v1109_v0, %v1108_v45  ;;  %v1100_v42 = vrot.slane %v1099_v33, 4 }
 0x237   : > { %1457 = vtanh.f32 %v982_v20  ;;  %v1050_v30 = vadd.f32 %v1034_v59, %v1961_v1  ;;  %v1084_v1 = vmul.f32 %v2027_v56, %v1043_v19  ;;  %v1157_v5 = vlaneseq }
 0x238   : > { %v1051_v13 = vadd.f32 %v1035_v2, %v1968_v22  ;;  %v1111_v12 = vrot.slane %v1110_v31, 2  ;;  %v1101_v17 = vadd.f32 %v1100_v42, %v1099_v33 }
 0x239   : > { %v1091_v25 = vmul.f32 %v2038_v9, %v1050_v30  ;;  %v1124_v23 = vadd.f32 %v1088_v53, %v1084_v1  ;;  %vm1159_vm4 = vcmp.lt.s32.totalorder %v1157_v5, 512 }
 0x23a   : > { %v1092_v4 = vmul.f32 %v2038_v9, %v1051_v13  ;;  %v1112_v34 = vadd.f32 %v1111_v12, %v1110_v31  ;;  %v1102_v14 = vrot.slane %v1101_v17, 2 }
 0x23b   : > { %v1116_v26 = vadd.f32 %v1115_v11, %v1091_v25 }
 0x23c   : > { %v1456_v6 = vpop.eup %1455  ;;  %v1125_v35 = vadd.f32 %v1124_v23, %v1092_v4  ;;  %v1113_v9 = vrot.slane %v1112_v34, 1  ;;  %v1103_v47 = vadd.f32 %v1102_v14, %v1101_v17 }
 0x23d   : > { %v1458_v24 = vpop.eup %1457  ;;  %v1038_v27 = vmul.f32 %v1456_v6, %v2020_v46 }
 0x23e   : > { %v1039_v22 = vmul.f32 %v1458_v24, %v2020_v46  ;;  %v1104_v41 = vrot.slane %v1103_v47, 1 }
 0x23f   : > { %v1054_v15 = vadd.f32 %v1038_v27, %v1954_v60 }
 0x240   : > { %v1055_v28 = vadd.f32 %v1039_v22, %v1957_v62  ;;  %v1114_v62 = vadd.f32 %v1113_v9, %v1112_v34  ;;  %v1105_v10 = vadd.f32 %v1104_v41, %v1103_v47 }
 0x241   : > { %v1095_v32 = vmul.f32 %v1079_v40, %v1054_v15 }
 0x242   : > { %v1096_v36 = vmul.f32 %v1079_v40, %v1055_v28  ;;  %v1140_v48 = vadd.f32 %v1138_v8, %v1114_v62  ;;  %v1139_v58 = vadd.f32 %v1138_v8, %v1105_v10 }
 0x243   : > { %v1117_v37 = vadd.f32 %v1116_v26, %v1095_v32 }
 0x244   : > { %v1126_v56 = vadd.f32 %v1125_v35, %v1096_v36  ;;  %v1147_v57 = vrot.slane %v1140_v48, 7 }
 0x245   : > { %v1118_v38 = vrot.slane %v1117_v37, 4 }
 0x246   : > { %v1127_v46 = vrot.slane %v1126_v56, 4  ;;  %v1151_v20 = vsel %vm1150_vm1, %v1139_v58, %v1147_v57 }
 0x247   : > { %v1119_v43 = vadd.f32 %v1118_v38, %v1117_v37 }
 0x248   : > { %v1128_v60 = vadd.f32 %v1127_v46, %v1126_v56 }
 0x249   : > { %v1120_v50 = vrot.slane %v1119_v43, 2 }
 0x24a   : > { %v1129_v51 = vrot.slane %v1128_v60, 2 }
 0x24b   : > { %v1121_v18 = vadd.f32 %v1120_v50, %v1119_v43 }
 0x24c   : > { %v1130_v45 = vadd.f32 %v1129_v51, %v1128_v60 }
 0x24d   : > { %v1122_v40 = vrot.slane %v1121_v18, 1 }
 0x24e   : > { %v1131_v49 = vrot.slane %v1130_v45, 1 }
 0x24f   : > { %v1123_v52 = vadd.f32 %v1122_v40, %v1121_v18 }
 0x250   : > { %v1132_v54 = vadd.f32 %v1131_v49, %v1130_v45 }
 0x251   : > { %v1141_v21 = vadd.f32 %v1138_v8, %v1123_v52 }
 0x252   : > { %v1142_v55 = vadd.f32 %v1138_v8, %v1132_v54 }
 0x253   : > { %v1148_v39 = vrot.slane %v1141_v21, 6 }
 0x254   : > { %v1149_v59 = vrot.slane %v1142_v55, 5 }
 0x256   : > { %v1153_v61 = vsel %vm1152_vm2, %v1148_v39, %v1149_v59 }
 0x257   : > { %v1155_v0 = vsel %vm1154_vm3, %v1151_v20, %v1153_v61 }
 0x258   : > { %1161 = vst.msk [vmem:[%s408_s17] sm:$0xf] %vm1159_vm4, %v1155_v0 }
 0x259   : > { %1516 = shalt.err (!%p1513_p7)
}
 0x25a   : > { %1312 = dma.vmem_to_hbm [thread:$0]  (%p1674_p11), %s1176_s13, 64, %s1178_s10, %s1163_s18  }
 0x25b PF: > { %s1189_s23 = sand.u32 1, %s1543_s19   ;;  %p1319_p8 = pnand %p1250_p9, %p1678_p12 }
 0x25c   : > { %s1190_s29 = scalar_lea.sflag [#allocation5], %s1189_s23 }
 0x25d   : > { %p1320_p10 = pneg %p1319_p8 }
 0x25f   : > { %1538 = dma.done.wait (%p1320_p10), %s1190_s29, 64  }
 0x260   : > { %1540 = vsyncadd (%p1320_p10), %s1190_s29, 4294967232  ;;  %s2138_s22 = sld [smem:[#allocation10_spill]]  ;;  %s2141_s19 = smov %s1547_s20 }
 0x261   : > { %s2139_s16 = sld [smem:[#allocation9_spill]] }
 0x262   : > { %s2140_s21 = sld [smem:[#allocation11_spill]] }
 0x266   : > { %p26_p1 = scmp.ge.s32.totalorder %s2138_s22, 4  }
 0x267   : > { %s2142_s20 = smov %s2139_s16 }
 0x268   :  { %28 = sbr.rel (!%p26_p1) target bundleno = 8 (0x8), region = 109 }
 0x26d   :  { %1196 = vsyncpa [#allocation4], 1 }
 0x26e   :  { %1198 = vsyncpa [#allocation4 + $0x1], 1 }
 0x26f   :  { %1199 = vsyncpa [#allocation5], 1 }
 0x270   :  { %1201 = vsyncpa [#allocation5 + $0x1], 1 }

</bundles_post_ra>
